<compile_context>
chip_gen: v7x
topology: tpu7x:2x2x1
jax: 0.10.0
libtpu: 0.0.40
codegen_flags: <defaults>
</compile_context>

<pallas_src>
import functools

import jax
import jax.numpy as jnp
from jax.experimental import pallas as pl
from jax.experimental.pallas import tpu as pltpu


def se_kernel(x_ref, w1t_ref, w2t_ref, o_ref, *, inv_hw):
    # x_ref : (B_blk, C, HW) -- channels on sublanes, unpadded flattened spatial
    #         on lanes (HW equals the full array dim, so no (8,128) issue).
    # w1t_ref: (C, C//r)  transpose of first Linear weight (resident).
    # w2t_ref: (C//r, C)  transpose of second Linear weight (resident).
    # Squeeze: exact global mean over the lane axis, accumulated in f32.
    y = jnp.sum(x_ref[...], axis=-1, dtype=jnp.float32) * inv_hw          # (B_blk, C)
    # Excitation: Linear -> ReLU -> Linear -> Sigmoid, all B_blk rows at once.
    h1 = jnp.dot(y, w1t_ref[...], preferred_element_type=jnp.float32)     # (B_blk, C//r)
    h1 = jnp.maximum(h1, 0.0)
    h2 = jnp.dot(h1, w2t_ref[...], preferred_element_type=jnp.float32)    # (B_blk, C)
    scale = jax.nn.sigmoid(h2)
    # Re-weight channels.  Re-read from the ref so the whole tile does not stay
    # live across the matmul/sigmoid chain (keeps vreg pressure low and lets
    # the scheduler stream vld/vst -- ~2 vld + 1 vst per vreg).
    o_ref[...] = (x_ref[...] * scale[:, :, None]).astype(o_ref.dtype)


def _tpu_budget_info():
    """Per-core VMEM capacity (bytes) and whether this looks like a 2-TC chip (v7x)."""
    vmem_cap = 128 * 2**20
    try:
        vmem_cap = int(pltpu.get_tpu_info().vmem_capacity_bytes)
    except Exception:
        pass
    is_v7x = False
    try:
        kind = jax.devices()[0].device_kind.lower()
        is_v7x = ("v7" in kind) or ("tpu7" in kind)
    except Exception:
        pass
    if is_v7x:
        vmem_cap = min(vmem_cap, 64 * 2**20)
    return vmem_cap, is_v7x


def _pick_b_blk(b, bytes_per_sample, block_budget, want_even_blocks):
    """Largest divisor of b whose block fits the budget; on v7x prefer an even
    number of grid steps so the two TensorCores split the batch evenly."""
    max_samples = max(1, block_budget // max(1, bytes_per_sample))
    divisors = [d for d in range(1, b + 1) if b % d == 0 and d <= max_samples]
    if not divisors:
        divisors = [1]
    if want_even_blocks and b >= 2:
        even = [d for d in divisors if (b // d) % 2 == 0]
        if even:
            return max(even)
    return max(divisors)


def se_layer_pallas(x_nchw, w1, w2):
    """SE layer forward.  x_nchw: (b, c, h, w); w1: (c//r, c); w2: (c, c//r)."""
    b, c, h, w = x_nchw.shape
    hw = h * w
    hidden = w1.shape[0]
    itemsize = x_nchw.dtype.itemsize

    # Unpadded flattened-spatial layout (b, c, hw).  No jnp.pad and no output
    # slice => no extra full-tensor HBM passes in the wrapper.
    x3 = x_nchw.reshape(b, c, hw)

    vmem_cap, is_v7x = _tpu_budget_info()
    # Pipeline footprint ~= 4x block (in + out, double-buffered) + weights.
    block_budget = (10 * 2**20) if is_v7x else (20 * 2**20)
    bytes_per_sample = c * hw * itemsize
    b_blk = _pick_b_blk(b, bytes_per_sample, block_budget, want_even_blocks=is_v7x)
    n_blocks = b // b_blk

    w1t = w1.T  # (c, c//r)
    w2t = w2.T  # (c//r, c)

    block_bytes = b_blk * bytes_per_sample
    weight_bytes = 2 * c * hidden * w1.dtype.itemsize
    # Explicit VMEM budget, clamped below physical per-core VMEM with headroom
    # (never rely on the 16/32 MiB scoped defaults, never exceed v7x's 64 MiB).
    vmem_limit = int(min(vmem_cap - (8 << 20),
                         max(32 << 20, 4 * block_bytes + 2 * weight_bytes + (4 << 20))))
    vmem_limit = max(vmem_limit, 16 << 20)

    # TODO(synk): when a single sample's (c, hw) tile exceeds the VMEM budget
    # (very large feature maps), fall back to a two-pass streamed kernel
    # (memory_space=pl.ANY + pltpu.emit_pipeline over hw chunks).
    # TODO(synk): a channels-on-lanes (b, hw, c) layout (c % 128 == 0, small hw)
    # would make every vreg fully dense, but only pays off if the NCHW
    # transpose can fuse into an adjacent op, so it is not done here.

    kernel = functools.partial(se_kernel, inv_hw=1.0 / float(hw))

    cost = pl.CostEstimate(
        flops=4 * b * c * hidden,                              # two tiny matmuls
        transcendentals=b * c,                                 # sigmoid
        bytes_accessed=2 * b * c * hw * itemsize + 2 * weight_bytes,
    )

    out3 = pl.pallas_call(
        kernel,
        out_shape=jax.ShapeDtypeStruct((b, c, hw), x_nchw.dtype),
        grid_spec=pltpu.PrefetchScalarGridSpec(
            num_scalar_prefetch=0,
            grid=(n_blocks,),
            in_specs=[
                pl.BlockSpec((b_blk, c, hw), lambda i: (i, 0, 0)),
                pl.BlockSpec((c, hidden), lambda i: (0, 0)),
                pl.BlockSpec((hidden, c), lambda i: (0, 0)),
            ],
            out_specs=pl.BlockSpec((b_blk, c, hw), lambda i: (i, 0, 0)),
        ),
        compiler_params=pltpu.CompilerParams(
            dimension_semantics=("parallel",),
            vmem_limit_bytes=vmem_limit,
        ),
        cost_estimate=cost,
    )(x3, w1t, w2t)

    return out3.reshape(b, c, h, w)


def se_layer_ref(x, w1, w2):
    y = jnp.mean(x, axis=(2, 3))                 # (b, c)
    h1 = jnp.maximum(y @ w1.T, 0.0)              # (b, c//r)
    s = jax.nn.sigmoid(h1 @ w2.T)                # (b, c)
    return x * s[:, :, None, None]


if __name__ == "__main__":
    channel, reduction = 32, 16
    b, h, w = 2, 8, 8
    hidden = channel // reduction

    key = jax.random.PRNGKey(0)
    kx, k1, k2 = jax.random.split(key, 3)
    x = jax.random.normal(kx, (b, channel, h, w), dtype=jnp.float32)
    # Deterministic synthetic weights (shapes match nn.Linear: (out, in), no bias).
    w1 = jax.random.normal(k1, (hidden, channel), dtype=jnp.float32) * 0.1
    w2 = jax.random.normal(k2, (channel, hidden), dtype=jnp.float32) * 0.1

    out = se_layer_pallas(x, w1, w2)
    out = jax.block_until_ready(out)

    ref = se_layer_ref(x, w1, w2)
    assert out.shape == (b, channel, h, w)
    assert jnp.allclose(out, ref, atol=1e-5, rtol=1e-5)
    print("KERNEL_OK")
</pallas_src>

<mosaic_0001>
module attributes {stable_mosaic.version = 11 : i64} {
  func.func @se_kernel(%arg0: i32, %arg1: memref<2x32x64xf32, #tpu.memory_space<vmem>>, %arg2: memref<32x2xf32, #tpu.memory_space<vmem>>, %arg3: memref<2x32xf32, #tpu.memory_space<vmem>>, %arg4: memref<2x32x64xf32, #tpu.memory_space<vmem>>) attributes {dimension_semantics = [#tpu.dimension_semantics<parallel>], iteration_bounds = array<i64: 1>, scalar_prefetch = 0 : i64, scratch_operands = 0 : i64, tpu.core_type = #tpu.core_type<tc>, window_params = [{transform_indices = @transform_0, window_bounds = array<i64: 2, 32, 64>}, {pipeline_mode = #tpu.pipeline_mode<synchronous>, transform_indices = @transform_1, window_bounds = array<i64: 32, 2>}, {pipeline_mode = #tpu.pipeline_mode<synchronous>, transform_indices = @transform_2, window_bounds = array<i64: 2, 32>}, {transform_indices = @transform_3, window_bounds = array<i64: 2, 32, 64>}]} {
    %c0 = arith.constant 0 : index
    %c0_0 = arith.constant 0 : index
    %c0_1 = arith.constant 0 : index
    %0 = vector.load %arg1[%c0, %c0_0, %c0_1] : memref<2x32x64xf32, #tpu.memory_space<vmem>>, vector<2x32x64xf32>
    %cst = arith.constant dense<0.000000e+00> : vector<2x32xf32>
    %1 = vector.multi_reduction <add>, %0, %cst [2] : vector<2x32x64xf32> to vector<2x32xf32>
    %cst_2 = arith.constant 1.562500e-02 : f32
    %2 = vector.broadcast %cst_2 : f32 to vector<2x32xf32>
    %3 = arith.mulf %1, %2 : vector<2x32xf32>
    %c0_3 = arith.constant 0 : index
    %c0_4 = arith.constant 0 : index
    %4 = vector.load %arg2[%c0_3, %c0_4] : memref<32x2xf32, #tpu.memory_space<vmem>>, vector<32x2xf32>
    %cst_5 = arith.constant dense<0.000000e+00> : vector<2x2xf32>
    %5 = tpu.matmul %3, %4, %cst_5 {dimension_numbers = #tpu.dot_dimension_numbers<[1], [0], [0], [1], [0, 0, 1, 1], [], []>} : vector<2x32xf32>, vector<32x2xf32>, vector<2x2xf32> -> vector<2x2xf32>
    %cst_6 = arith.constant 0.000000e+00 : f32
    %6 = vector.broadcast %cst_6 : f32 to vector<2x2xf32>
    %7 = arith.maximumf %5, %6 : vector<2x2xf32>
    %c0_7 = arith.constant 0 : index
    %c0_8 = arith.constant 0 : index
    %8 = vector.load %arg3[%c0_7, %c0_8] : memref<2x32xf32, #tpu.memory_space<vmem>>, vector<2x32xf32>
    %cst_9 = arith.constant dense<0.000000e+00> : vector<2x32xf32>
    %9 = tpu.matmul %7, %8, %cst_9 {dimension_numbers = #tpu.dot_dimension_numbers<[1], [0], [0], [1], [0, 0, 1, 1], [], []>} : vector<2x2xf32>, vector<2x32xf32>, vector<2x32xf32> -> vector<2x32xf32>
    %10 = arith.negf %9 : vector<2x32xf32>
    %11 = math.exp %10 : vector<2x32xf32>
    %cst_10 = arith.constant 1.000000e+00 : f32
    %12 = vector.broadcast %cst_10 : f32 to vector<2x32xf32>
    %13 = arith.addf %12, %11 : vector<2x32xf32>
    %14 = arith.divf %12, %13 : vector<2x32xf32>
    %c0_11 = arith.constant 0 : index
    %c0_12 = arith.constant 0 : index
    %c0_13 = arith.constant 0 : index
    %15 = vector.load %arg1[%c0_11, %c0_12, %c0_13] : memref<2x32x64xf32, #tpu.memory_space<vmem>>, vector<2x32x64xf32>
    %16 = vector.shape_cast %14 : vector<2x32xf32> to vector<2x32x1xf32>
    %17 = vector.broadcast %16 : vector<2x32x1xf32> to vector<2x32x64xf32>
    %18 = arith.mulf %15, %17 : vector<2x32x64xf32>
    %c0_14 = arith.constant 0 : index
    %c0_15 = arith.constant 0 : index
    %c0_16 = arith.constant 0 : index
    %19 = vector.load %arg4[%c0_14, %c0_15, %c0_16] : memref<2x32x64xf32, #tpu.memory_space<vmem>>, vector<2x32x64xf32>
    tpu.vector_store %arg4[%c0_14, %c0_15, %c0_16], %18 {strides = array<i32>} : memref<2x32x64xf32, #tpu.memory_space<vmem>>, vector<2x32x64xf32>,
    return
  }
  func.func @transform_0(%arg0: i32) -> (i32, i32, i32) {
    %c0_i32 = arith.constant 0 : i32
    %c0_i32_0 = arith.constant 0 : i32
    %c0_i32_1 = arith.constant 0 : i32
    return %arg0, %c0_i32, %c0_i32_0 : i32, i32, i32
  }
  func.func @transform_1(%arg0: i32) -> (i32, i32) {
    %c0_i32 = arith.constant 0 : i32
    %c0_i32_0 = arith.constant 0 : i32
    %c0_i32_1 = arith.constant 0 : i32
    return %c0_i32, %c0_i32_0 : i32, i32
  }
  func.func @transform_2(%arg0: i32) -> (i32, i32) {
    %c0_i32 = arith.constant 0 : i32
    %c0_i32_0 = arith.constant 0 : i32
    %c0_i32_1 = arith.constant 0 : i32
    return %c0_i32, %c0_i32_0 : i32, i32
  }
  func.func @transform_3(%arg0: i32) -> (i32, i32, i32) {
    %c0_i32 = arith.constant 0 : i32
    %c0_i32_0 = arith.constant 0 : i32
    %c0_i32_1 = arith.constant 0 : i32
    return %arg0, %c0_i32, %c0_i32_0 : i32, i32, i32
  }
}

</mosaic_0001>

<bundles_post_ra>
// kernel: tpu_custom_call.1
= control target key start
LH: loop header
LB: loop body
LE: loop exit
PB: predicated region body
PF: predicated region fallthrough
CT: control target
= control target key end

     0   :  { %8 = vsyncpa [#allocation3], 0  ;;  %s582_s0 = inlined_call_operand.hbm [shape: f32[2,32,64], index: 0, kind: input, shape index: {}]   ;;  %s583_s1 = inlined_call_operand.vmem [shape: f32[32,2], index: 1, kind: input, shape index: {}]   ;;  %s584_s2 = inlined_call_operand.vmem [shape: f32[2,32], index: 2, kind: input, shape index: {}]   ;;  %s585_s3 = inlined_call_operand.hbm [shape: f32[2,32,64], index: 3, kind: output, shape index: {}]  }
   0x1   :  { %9 = vsyncpa [#allocation4], 0  ;;  %s452_s12 = smov [#allocation2]   ;;  %s404_s16 = scalar_lea.hbm %s582_s0, 1024 }
   0x2   :  { %s15_s13 = sshll.u32 %s452_s12, 4  ;;  %p405_p0 = scmp.ne.s32.totalorder %s582_s0, %s404_s16  ;;  %s16_s13 = int_to_ptr.vmem [resolvable:$true] %s15_s13 }
   0x3   :  { %p408_p1 = scmp.lt.u32.totalorder %s404_s16, %s582_s0 }
   0x5   :  { %p410_p2 = pnand %p408_p1, %p405_p0 }
   0x7   :  { %413 = shalt.err (!%p410_p2)
}
   0x8   :  { %s414_s21 = scalar_lea.vmem %s16_s13, 1024  ;;  %p419_p4 = scmp.lt.s32.totalorder %s16_s13, %s16_s13 }
   0x9   :  { %p415_p3 = scmp.ne.s32.totalorder %s16_s13, %s414_s21  ;;  %p420_p5 = scmp.lt.s32.totalorder %s414_s21, %s414_s21 }
   0xb   :  { %p421_p6 = por %p420_p5, %p419_p4 }
   0xd   :  { %p422_p7 = pnand %p421_p6, %p415_p3 }
   0xf   :  { %425 = shalt.err (!%p422_p7)
}
  0x10   :  { %s453_s22 = smov 128   ;;  %s454_s23 = smov 8  }
  0x11   :  { %21 = dma.hbm_to_vmem [thread:$0]  %s582_s0, 1024, %s16_s13, [#allocation3], %s453_s22, %s453_s22, %s454_s23  }
  0x12   :  { %448 = dma.done.wait [#allocation3], 1024  }
  0x13   :  { %449 = vsyncadd [#allocation3], 4294966272  ;;  %vm37_vm0 = vcmask 523264   ;;  %v494_v0 = vld [vmem:[#allocation2 + $0x20] sm:$0xff]  ;;  %v498_v2 = vld [vmem:[#allocation2 + $0x28] sm:$0xff]  ;;  %v455_v19 = vmov 0.0|0.0   ;;  %v82_v24 = vlaneseq }
  0x14   :  { %v496_v1 = vld [vmem:[#allocation2] sm:$0xff]  ;;  %v50_v3 = vsel %vm37_vm0, %v494_v0, 0.0  ;;  %v504_v5 = vld [vmem:[#allocation2 + $0x8] sm:$0xff]  ;;  %v53_v6 = vsel %vm37_vm0, %v498_v2, 0.0  ;;  %v510_v8 = vld [vmem:[#allocation2 + $0x30] sm:$0xff]  ;;  %387 = vmatprep.subr.bf16.mxu0 %v455_v19  ;;  %vm456_vm1 = vmmov 0  }
  0x15   :  { %v38_v4 = vsel %vm37_vm0, %v496_v1, 0.0  ;;  %51 = vadd.xlane.f32.xlu1 %v50_v3  ;;  %v41_v7 = vsel %vm37_vm0, %v504_v5, 0.0  ;;  %v512_v9 = vld [vmem:[#allocation2 + $0x10] sm:$0xff]  ;;  %v56_v10 = vsel %vm37_vm0, %v510_v8, 0.0  ;;  %v518_v12 = vld [vmem:[#allocation2 + $0x38] sm:$0xff]  ;;  %v70_v16 = vld [vmem:[%s583_s1] sm:$0xff] }
  0x16   :  { %39 = vadd.xlane.f32.xlu0 %v38_v4  ;;  %v44_v11 = vsel %vm37_vm0, %v512_v9, 0.0  ;;  %v520_v13 = vld [vmem:[#allocation2 + $0x18] sm:$0xff]  ;;  %v59_v14 = vsel %vm37_vm0, %v518_v12, 0.0  ;;  %v71_v17 = vld [vmem:[%s583_s1 + $0x8] sm:$0xff]  ;;  %v72_v20 = vld [vmem:[%s583_s1 + $0x10] sm:$0xff]  ;;  %v457_v23 = vmov 0.0  }
  0x17   :  { %v47_v15 = vsel %vm37_vm0, %v520_v13, 0.0  ;;  %v388_v18 = vpack.c.bf16 %v71_v17, %v70_v16  ;;  %v73_v21 = vld [vmem:[%s583_s1 + $0x18] sm:$0xff]  ;;  %379 = vmatprep.mubr.msk.f32.mxu0 %vm456_vm1, %v457_v23  ;;  %382 = vmatprep.subr.mxu1 %v457_v23  ;;  %v83_v27 = vand.u32 127, %v82_v24  ;;  %v538_v29 = vshrl.u32 %v82_v24, 7  ;;  %v204_v4 = vld [vmem:[%s584_s2] sm:$0x3] }
  0x18   :  { %v391_v22 = vpack.c.bf16 %v73_v21, %v72_v20  ;;  %384 = vmatprep.mubr.msk.f32.mxu1 %vm456_vm1, %v457_v23  ;;  %vm93_vm2 = vcmask 130112   ;;  %vm100_vm3 = vcmask 195712   ;;  %vm107_vm4 = vcmask 261312   ;;  %s458_s2 = smov [#allocation5]  }
  0x19   :  { %54 = vadd.xlane.f32.xlu1 %v53_v6  ;;  %389 = vmatpush3.bf16.msra.mxu0 %v388_v18  ;;  %v88_v28 = vadd.s32 4294967288, %v83_v27  ;;  %v95_v32 = vadd.s32 4294967280, %v83_v27  ;;  %v102_v36 = vadd.s32 4294967272, %v83_v27  ;;  %v86_v37 = vsub.s32 %v83_v27, %v538_v29  ;;  %s348_s7 = sshll.u32 %s458_s2, 4  ;;  %s349_s7 = int_to_ptr.vmem [resolvable:$true] %s348_s7 }
  0x1a   :  { %42 = vadd.xlane.f32.xlu0 %v41_v7  ;;  %390 = vmatprep.subr.bf16.mxu0 %v455_v19  ;;  %vm128_vm5 = vcmask 1041409   ;;  %vm130_vm6 = vcmask 261120   ;;  %vm209_vm7 = vcmask 1041408   ;;  %vm205_vm8 = vcmask 15360   ;;  %s426_s8 = scalar_lea.vmem %s349_s7, 1024  ;;  %p431_p9 = scmp.lt.s32.totalorder %s349_s7, %s349_s7 }
  0x1b   :  { %v91_v33 = vsub.s32 %v88_v28, %v538_v29  ;;  %v98_v38 = vsub.s32 %v95_v32, %v538_v29  ;;  %v105_v47 = vsub.s32 %v102_v36, %v538_v29  ;;  %383 = vmatpush3.msk.msra.mxu1 %vm209_vm7, %v204_v4  ;;  %v291_v18 = vsub.s32 0, %v538_v29  ;;  %p427_p8 = scmp.ne.s32.totalorder %s349_s7, %s426_s8  ;;  %p432_p10 = scmp.lt.s32.totalorder %s426_s8, %s426_s8 }
  0x1c   :  { %v310_v21 = vsub.s32 1, %v538_v29 }
  0x1d   :  { %57 = vadd.xlane.f32.xlu1 %v56_v10  ;;  %392 = vmatpush3.bf16.msra.mxu0 %v391_v22  ;;  %p433_p11 = por %p432_p10, %p431_p9 }
  0x1e   :  { %45 = vadd.xlane.f32.xlu0 %v44_v11 }
  0x1f   :  { %p434_p12 = pnand %p433_p11, %p427_p8 }
  0x21   :  { %60 = vadd.xlane.f32.xlu1 %v59_v14 }
  0x22   :  { %48 = vadd.xlane.f32.xlu0 %v47_v15 }
  0xa2   :  { %v52_v25 = vpop.xlane.xlu1 %51 }
  0xa3   :  { %v40_v26 = vpop.xlane.xlu0 %39  ;;  %v66_v41 = vmul.f32 0.015625, %v52_v25 }
  0xa4   :  { %v62_v42 = vmul.f32 0.015625, %v40_v26 }
  0xa5   :  { %v112_v52 = vrot.slane %v66_v41, %v86_v37 }
  0xa6   :  { %v55_v30 = vpop.xlane.xlu1 %54  ;;  %v87_v53 = vrot.slane %v62_v42, %v86_v37 }
  0xa7   :  { %v43_v31 = vpop.xlane.xlu0 %42  ;;  %v67_v34 = vmul.f32 0.015625, %v55_v30 }
  0xa8   :  { %v63_v35 = vmul.f32 0.015625, %v43_v31 }
  0xa9   :  { %v116_v45 = vrot.slane %v67_v34, %v91_v33 }
  0xaa   :  { %v58_v39 = vpop.xlane.xlu1 %57  ;;  %v92_v46 = vrot.slane %v63_v35, %v91_v33 }
  0xab   :  { %v46_v40 = vpop.xlane.xlu0 %45  ;;  %v68_v43 = vmul.f32 0.015625, %v58_v39  ;;  %v117_v56 = vsel %vm93_vm2, %v116_v45, %v112_v52 }
  0xac   :  { %v64_v44 = vmul.f32 0.015625, %v46_v40  ;;  %v94_v57 = vsel %vm93_vm2, %v92_v46, %v87_v53 }
  0xad   :  { %v121_v48 = vrot.slane %v68_v43, %v98_v38 }
  0xae   :  { %v99_v49 = vrot.slane %v64_v44, %v98_v38  ;;  %v61_v50 = vpop.xlane.xlu1 %60 }
  0xaf   :  { %v49_v51 = vpop.xlane.xlu0 %48  ;;  %v69_v54 = vmul.f32 0.015625, %v61_v50  ;;  %v122_v60 = vsel %vm100_vm3, %v121_v48, %v117_v56 }
  0xb0   :  { %v65_v55 = vmul.f32 0.015625, %v49_v51  ;;  %v101_v61 = vsel %vm100_vm3, %v99_v49, %v94_v57 }
  0xb1   :  { %v126_v58 = vrot.slane %v69_v54, %v105_v47 }
  0xb2   :  { %v106_v59 = vrot.slane %v65_v55, %v105_v47 }
  0xb3   :  { %v127_v63 = vsel %vm107_vm4, %v126_v58, %v122_v60 }
  0xb4   :  { %v108_v62 = vsel %vm107_vm4, %v106_v59, %v101_v61 }
  0xb5   :  { %v129_v3 = vsel %vm128_vm5, %v127_v63, %v108_v62 }
  0xb6   :  { %380 = vmatmul.mubr.msk.f32.vlgmr.msra.gmra.mrb[0].mxu0 %vm130_vm6, %v129_v3 }
 0x189   :  { %v199_v6 = vpop.f32.mrb[0].mxu0 }
 0x18a   :  { %v203_v7 = vmax.f32 %v199_v6, 0.0  ;;  %v381_v10 = vpop.f32.mrb[1].mxu0 }
 0x18c   :  { %385 = vmatmul.mubr.msk.f32.vlgmr.msra.gmra.mrb[0].mxu1 %vm205_vm8, %v203_v7 }
 0x25f   :  { %v279_v11 = vpop.f32.mrb[0].mxu1 }
 0x260   :  { %v363_v14 = vmul.f32 -1.442695, %v279_v11  ;;  %v386_v15 = vpop.f32.mrb[1].mxu1 }
 0x262   :  { %400 = vpow2.f32 %v363_v14 }
 0x26c   :  { %v401_v16 = vpop.eup %400 }
 0x26d   :  { %v286_v17 = vadd.f32 1.0, %v401_v16 }
 0x26f   :  { %402 = vrcp.f32 %v286_v17 }
 0x279   :  { %v403_v19 = vpop.eup %402 }
 0x27a   :  { %v292_v20 = vrot.slane %v403_v19, %v291_v18  ;;  %v311_v22 = vrot.slane %v403_v19, %v310_v21 }
 0x27c   :  { %298 = vbcast.lane.b32.xlu1 %v292_v20, 264  ;;  %294 = vbcast.lane.b32.xlu0 %v292_v20, 256 }
 0x280   :  { %302 = vbcast.lane.b32.xlu1 %v292_v20, 272  ;;  %313 = vbcast.lane.b32.xlu0 %v311_v22, 256 }
 0x284   :  { %306 = vbcast.lane.b32.xlu1 %v292_v20, 280  ;;  %321 = vbcast.lane.b32.xlu0 %v311_v22, 272 }
 0x288   :  { %317 = vbcast.lane.b32.xlu1 %v311_v22, 264 }
 0x28c   :  { %325 = vbcast.lane.b32.xlu1 %v311_v22, 280 }
 0x2ee   :  { %v299_v23 = vpop.permute.xlu1 %298  ;;  %v295_v24 = vpop.permute.xlu0 %294 }
 0x2ef   :  { %v328_v25 = vmul.f32 %v299_v23, %v504_v5  ;;  %v327_v26 = vmul.f32 %v295_v24, %v496_v1 }
 0x2f1   :  { %336 = vst.msk [vmem:[#allocation5 + $0x8] sm:$0xff] %vm37_vm0, %v328_v25  ;;  %335 = vst.msk [vmem:[#allocation5] sm:$0xff] %vm37_vm0, %v327_v26 }
 0x2f2   :  { %v303_v27 = vpop.permute.xlu1 %302  ;;  %v314_v28 = vpop.permute.xlu0 %313 }
 0x2f3   :  { %v329_v29 = vmul.f32 %v303_v27, %v512_v9  ;;  %v331_v30 = vmul.f32 %v314_v28, %v494_v0 }
 0x2f5   :  { %337 = vst.msk [vmem:[#allocation5 + $0x10] sm:$0xff] %vm37_vm0, %v329_v29  ;;  %339 = vst.msk [vmem:[#allocation5 + $0x20] sm:$0xff] %vm37_vm0, %v331_v30 }
 0x2f6   :  { %v307_v31 = vpop.permute.xlu1 %306  ;;  %v322_v32 = vpop.permute.xlu0 %321 }
 0x2f7   :  { %v330_v5 = vmul.f32 %v307_v31, %v520_v13  ;;  %v333_v1 = vmul.f32 %v322_v32, %v510_v8 }
 0x2f9   :  { %338 = vst.msk [vmem:[#allocation5 + $0x18] sm:$0xff] %vm37_vm0, %v330_v5  ;;  %341 = vst.msk [vmem:[#allocation5 + $0x30] sm:$0xff] %vm37_vm0, %v333_v1 }
 0x2fa   :  { %v318_v33 = vpop.permute.xlu1 %317 }
 0x2fb   :  { %v332_v34 = vmul.f32 %v318_v33, %v498_v2 }
 0x2fd   :  { %340 = vst.msk [vmem:[#allocation5 + $0x28] sm:$0xff] %vm37_vm0, %v332_v34 }
 0x2fe   :  { %v326_v0 = vpop.permute.xlu1 %325 }
 0x2ff   :  { %v334_v9 = vmul.f32 %v326_v0, %v518_v12 }
 0x301   :  { %342 = vst.msk [vmem:[#allocation5 + $0x38] sm:$0xff] %vm37_vm0, %v334_v9 }
 0x302   :  { %437 = shalt.err (!%p434_p12)
}
 0x303   :  { %s438_s11 = scalar_lea.hbm %s585_s3, 1024 }
 0x304   :  { %p439_p13 = scmp.ne.s32.totalorder %s585_s3, %s438_s11  ;;  %p442_p0 = scmp.lt.u32.totalorder %s438_s11, %s585_s3 }
 0x306   :  { %p444_p1 = pnand %p442_p0, %p439_p13 }
 0x308   :  { %447 = shalt.err (!%p444_p1)
}
 0x309   :  { %354 = dma.vmem_to_hbm [thread:$0]  %s349_s7, 1024, %s585_s3, [#allocation4], %s453_s22, %s453_s22, %s454_s23  }
 0x30a   :  { %450 = dma.done.wait [#allocation4], 1024  }
 0x30b   :  { %451 = vsyncadd [#allocation4], 4294966272 }
 0x30c   :  { %358 = vsyncpa [#allocation3], 1 }
 0x30d   :  { %359 = vsyncpa [#allocation4], 1 }

</bundles_post_ra>
